<compile_context>
chip_gen: v7x
topology: tpu7x:2x2x1
jax: 0.10.0
libtpu: 0.0.40
codegen_flags: <defaults>
</compile_context>

<pallas_src>
import jax
import jax.numpy as jnp
from jax.experimental import pallas as pl
from jax.experimental.pallas import tpu as pltpu

_MIB = 1024 * 1024
# Keep double-buffered per-step blocks comfortably under v7x's 64 MiB VMEM.
_VMEM_BUDGET = 40 * _MIB


def _group_linear_bias_kernel(x_ref, w_ref, b_ref, o_ref):
    """x_ref: (Bb, Cb, I), w_ref: (Cb, I, J), b_ref: (Cb, J), o_ref: (Bb, Cb, J)."""
    acc = jnp.einsum("bci,cij->bcj", x_ref[...], w_ref[...],
                     preferred_element_type=jnp.float32)
    acc = acc + b_ref[...].astype(jnp.float32)[None, :, :]
    o_ref[...] = acc.astype(o_ref.dtype)


def _group_linear_kernel(x_ref, w_ref, o_ref):
    """Bias-free variant: x_ref: (Bb, Cb, I), w_ref: (Cb, I, J), o_ref: (Bb, Cb, J)."""
    acc = jnp.einsum("bci,cij->bcj", x_ref[...], w_ref[...],
                     preferred_element_type=jnp.float32)
    o_ref[...] = acc.astype(o_ref.dtype)


def _footprint_bytes(b_blk, c_blk, I, J, x_bytes, w_bytes, o_bytes, bias_bytes):
    x_tile = b_blk * c_blk * I * x_bytes
    w_tile = c_blk * I * J * w_bytes
    o_tile = b_blk * c_blk * J * o_bytes
    b_tile = c_blk * J * bias_bytes
    return 2 * (x_tile + w_tile + o_tile + b_tile)  # double-buffered pipeline


def _legal_class_blocks(C):
    # Sublane rule: the class dim is second-to-last of the x/out/bias blocks,
    # so a partial class block must be a multiple of 8 (or the full C).
    cands = {C}
    cb = 8
    while cb < C:
        if C % cb == 0:
            cands.add(cb)
        cb += 8
    return sorted(cands, reverse=True)  # largest first


def _divisors_desc(n):
    return [d for d in range(n, 0, -1) if n % d == 0]


def group_linear(x, weight, bias=None, *, class_block=None, b_block=None,
                 compute_dtype=None):
    """x: (B, C, I), weight: (C, I, J), bias: (C, J) or None -> (B, C, J)."""
    B, C, I = x.shape
    Cw, Iw, J = weight.shape
    assert (Cw, Iw) == (C, I), (weight.shape, x.shape)

    out_dtype = x.dtype
    if compute_dtype is not None:
        # Feed the MXU narrow operands (e.g. bf16); accumulation stays f32.
        x = x.astype(compute_dtype)
        weight = weight.astype(compute_dtype)

    x_bytes = jnp.dtype(x.dtype).itemsize
    w_bytes = jnp.dtype(weight.dtype).itemsize
    o_bytes = jnp.dtype(out_dtype).itemsize
    bias_bytes = jnp.dtype(bias.dtype).itemsize if bias is not None else 0

    # --- pick class block -------------------------------------------------
    if class_block is None:
        legal = _legal_class_blocks(C)
        class_block = legal[-1]  # smallest legal block as fallback
        for cb in legal:
            if _footprint_bytes(B, cb, I, J, x_bytes, w_bytes, o_bytes,
                                bias_bytes) <= _VMEM_BUDGET:
                class_block = cb
                break
    assert C % class_block == 0, (C, class_block)
    assert class_block == C or class_block % 8 == 0, class_block

    # --- pick batch block (innermost grid axis; weight block stays resident)
    if b_block is None:
        b_block = 1
        for bb in _divisors_desc(B):
            if _footprint_bytes(bb, class_block, I, J, x_bytes, w_bytes,
                                o_bytes, bias_bytes) <= _VMEM_BUDGET:
                b_block = bb
                break
        # Guarantee >=2 grid steps when possible so v7x's 2nd TC has work.
        if (C // class_block) * (B // b_block) < 2 and B > 1:
            b_block = next(d for d in _divisors_desc(B) if d < B)
    assert B % b_block == 0, (B, b_block)

    grid = (C // class_block, B // b_block)  # batch innermost -> weight reuse

    footprint = _footprint_bytes(b_block, class_block, I, J, x_bytes, w_bytes,
                                 o_bytes, bias_bytes)
    vmem_limit = int(min(64 * _MIB, max(32 * _MIB, footprint + 8 * _MIB)))

    in_specs = [
        pl.BlockSpec((b_block, class_block, I), lambda c, b: (b, c, 0)),
        pl.BlockSpec((class_block, I, J), lambda c, b: (c, 0, 0)),
    ]
    args = [x, weight]
    if bias is not None:
        in_specs.append(pl.BlockSpec((class_block, J), lambda c, b: (c, 0)))
        args.append(bias)
        kernel = _group_linear_bias_kernel
    else:
        kernel = _group_linear_kernel

    return pl.pallas_call(
        kernel,
        out_shape=jax.ShapeDtypeStruct((B, C, J), out_dtype),
        grid_spec=pltpu.PrefetchScalarGridSpec(
            num_scalar_prefetch=0,
            grid=grid,
            in_specs=in_specs,
            out_specs=pl.BlockSpec((b_block, class_block, J),
                                   lambda c, b: (b, c, 0)),
        ),
        compiler_params=pltpu.CompilerParams(
            dimension_semantics=("parallel", "parallel"),
            vmem_limit_bytes=vmem_limit,
        ),
    )(*args)


def init_group_linear_params(key, num_classes, in_features, out_features,
                             dtype=jnp.float32, with_bias=True):
    # xavier_normal_: std = sqrt(2 / (fan_in + fan_out)) over the last two dims.
    std = (2.0 / (in_features + out_features)) ** 0.5
    w = jax.random.normal(key, (num_classes, in_features, out_features),
                          dtype=dtype) * std
    b = jnp.zeros((num_classes, out_features), dtype=dtype) if with_bias else None
    return w, b


def _check(x, weight, bias, y, atol=1e-4, rtol=1e-4):
    y_ref = jnp.einsum("bci,cij->bcj", x, weight)
    if bias is not None:
        y_ref = y_ref + bias[None, :, :]
    assert y.shape == y_ref.shape, (y.shape, y_ref.shape)
    assert jnp.allclose(y, y_ref, atol=atol, rtol=rtol)


if __name__ == "__main__":
    root = jax.random.PRNGKey(0)
    k1x, k1w, k2x, k2w = jax.random.split(root, 4)

    # 1) Shipped small shape, with bias, default tiling (all classes fused,
    #    batch split so the grid has >=2 parallel steps).
    B, C, I, J = 8, 4, 32, 64
    x = jax.random.normal(k1x, (B, C, I), dtype=jnp.float32)
    weight, bias = init_group_linear_params(k1w, C, I, J)
    y = group_linear(x, weight, bias)
    jax.block_until_ready(y)
    _check(x, weight, bias, y)

    # 2) Larger class count, bias=None path, explicit class blocking
    #    (grid = (4 class blocks, batch blocks)).
    B2, C2, I2, J2 = 8, 32, 32, 64
    x2 = jax.random.normal(k2x, (B2, C2, I2), dtype=jnp.float32)
    w2, _ = init_group_linear_params(k2w, C2, I2, J2, with_bias=False)
    y2 = group_linear(x2, w2, None, class_block=8)
    jax.block_until_ready(y2)
    _check(x2, w2, None, y2)

    # 3) bf16 MXU operands with f32 accumulation (optional fast path).
    y3 = group_linear(x, weight, bias, compute_dtype=jnp.bfloat16)
    jax.block_until_ready(y3)
    _check(x, weight, bias, y3, atol=1e-1, rtol=1e-1)

    print("KERNEL_OK")
</pallas_src>

<mosaic_0001>
module attributes {stable_mosaic.version = 11 : i64} {
  func.func @_group_linear_bias_kernel(%arg0: i32, %arg1: i32, %arg2: memref<4x4x32xf32, #tpu.memory_space<vmem>>, %arg3: memref<4x32x64xf32, #tpu.memory_space<vmem>>, %arg4: memref<4x64xf32, #tpu.memory_space<vmem>>, %arg5: memref<4x4x64xf32, #tpu.memory_space<vmem>>) attributes {dimension_semantics = [#tpu.dimension_semantics<parallel>, #tpu.dimension_semantics<parallel>], iteration_bounds = array<i64: 1, 2>, scalar_prefetch = 0 : i64, scratch_operands = 0 : i64, tpu.core_type = #tpu.core_type<tc>, window_params = [{transform_indices = @transform_0, window_bounds = array<i64: 4, 4, 32>}, {transform_indices = @transform_1, window_bounds = array<i64: 4, 32, 64>}, {transform_indices = @transform_2, window_bounds = array<i64: 4, 64>}, {transform_indices = @transform_3, window_bounds = array<i64: 4, 4, 64>}]} {
    %c0 = arith.constant 0 : index
    %c0_0 = arith.constant 0 : index
    %c0_1 = arith.constant 0 : index
    %0 = vector.load %arg2[%c0, %c0_0, %c0_1] : memref<4x4x32xf32, #tpu.memory_space<vmem>>, vector<4x4x32xf32>
    %c0_2 = arith.constant 0 : index
    %c0_3 = arith.constant 0 : index
    %c0_4 = arith.constant 0 : index
    %1 = vector.load %arg3[%c0_2, %c0_3, %c0_4] : memref<4x32x64xf32, #tpu.memory_space<vmem>>, vector<4x32x64xf32>
    "tpu.trace_start"() <{level = 10 : i32, message = "bci,cij->bcj"}> : () -> ()
    %cst = arith.constant dense<0.000000e+00> : vector<4x64x4xf32>
    %2 = tpu.matmul %1, %0, %cst {dimension_numbers = #tpu.dot_dimension_numbers<[1], [2], [2], [0], [0, 0, 0, 2, 1, 0], [0], [1]>} : vector<4x32x64xf32>, vector<4x4x32xf32>, vector<4x64x4xf32> -> vector<4x64x4xf32>
    %3 = tpu.transpose %2, [2, 0, 1] : vector<4x64x4xf32> -> vector<4x4x64xf32>
    "tpu.trace_stop"() : () -> ()
    %c0_5 = arith.constant 0 : index
    %c0_6 = arith.constant 0 : index
    %4 = vector.load %arg4[%c0_5, %c0_6] : memref<4x64xf32, #tpu.memory_space<vmem>>, vector<4x64xf32>
    %5 = vector.shape_cast %4 : vector<4x64xf32> to vector<1x4x64xf32>
    %6 = vector.broadcast %5 : vector<1x4x64xf32> to vector<4x4x64xf32>
    %7 = arith.addf %3, %6 : vector<4x4x64xf32>
    %c0_7 = arith.constant 0 : index
    %c0_8 = arith.constant 0 : index
    %c0_9 = arith.constant 0 : index
    %8 = vector.load %arg5[%c0_7, %c0_8, %c0_9] : memref<4x4x64xf32, #tpu.memory_space<vmem>>, vector<4x4x64xf32>
    tpu.vector_store %arg5[%c0_7, %c0_8, %c0_9], %7 {strides = array<i32>} : memref<4x4x64xf32, #tpu.memory_space<vmem>>, vector<4x4x64xf32>,
    return
  }
  func.func @transform_0(%arg0: i32, %arg1: i32) -> (i32, i32, i32) {
    %c0_i32 = arith.constant 0 : i32
    %c0_i32_0 = arith.constant 0 : i32
    return %arg1, %arg0, %c0_i32 : i32, i32, i32
  }
  func.func @transform_1(%arg0: i32, %arg1: i32) -> (i32, i32, i32) {
    %c0_i32 = arith.constant 0 : i32
    %c0_i32_0 = arith.constant 0 : i32
    %c0_i32_1 = arith.constant 0 : i32
    return %arg0, %c0_i32, %c0_i32_0 : i32, i32, i32
  }
  func.func @transform_2(%arg0: i32, %arg1: i32) -> (i32, i32) {
    %c0_i32 = arith.constant 0 : i32
    %c0_i32_0 = arith.constant 0 : i32
    return %arg0, %c0_i32 : i32, i32
  }
  func.func @transform_3(%arg0: i32, %arg1: i32) -> (i32, i32, i32) {
    %c0_i32 = arith.constant 0 : i32
    %c0_i32_0 = arith.constant 0 : i32
    return %arg1, %arg0, %c0_i32 : i32, i32, i32
  }
}

</mosaic_0001>

<bundles_post_ra>
// kernel: tpu_custom_call.1
= control target key start
LH: loop header
LB: loop body
LE: loop exit
PB: predicated region body
PF: predicated region fallthrough
CT: control target
= control target key end

     0   :  { %8 = vsyncpa [#allocation3], 0  ;;  %s3770_s0 = inlined_call_operand.hbm [shape: f32[8,4,32], index: 0, kind: input, shape index: {}]   ;;  %s3771_s1 = inlined_call_operand.hbm [shape: f32[4,32,64], index: 1, kind: input, shape index: {}]   ;;  %s3772_s2 = inlined_call_operand.vmem [shape: f32[4,64], index: 2, kind: input, shape index: {}]   ;;  %s3773_s3 = inlined_call_operand.hbm [shape: f32[8,4,64], index: 3, kind: output, shape index: {}]  }
   0x1   :  { %10 = vsyncpa [#allocation3 + $0x1], 0 }
   0x2   :  { %11 = vsyncpa [#allocation6], 0 }
   0x3   :  { %12 = vsyncpa [#allocation4], 0 }
   0x4   :  { %14 = vsyncpa [#allocation4 + $0x1], 0  ;;  %s3382_s12 = smov 0   ;;  %s3384_s13 = smov 0  }
   0x5   :  { %s3386_s14 = smov 0   ;;  %s3388_s15 = smov 0  }
   0x6   :  { %s3390_s16 = smov 0   ;;  %s3392_s17 = smov 0  }
   0x7 LB: > { %s2910_s18 = sadd.s32 4294967295, %s3348_s17   ;;  %s2911_s19 = sadd.s32 4294967294, %s3348_s17   ;;  %s3348_s17 = sphi %s3392_s17, %s20_s17   ;;  %s3344_s16 = sphi %s3390_s16, %s3797_s16   ;;  %s3340_s15 = sphi %s3388_s15, %s3796_s15   ;;  %s3336_s14 = sphi %s3386_s14, %s3795_s14   ;;  %s3332_s13 = sphi %s3384_s13, %s3794_s13   ;;  %s3328_s12 = sphi %s3382_s12, %s3793_s12  }
   0x8   : > { %p54_p0 = scmp.ne.s32.totalorder %s3332_s13, %s3328_s12  ;;  %p3416_p1 = scmp.eq.s32.totalorder %s2910_s18, 0 }
   0x9   : > { %p3420_p2 = scmp.eq.s32.totalorder %s2910_s18, 1  ;;  %p138_p3 = scmp.eq.s32.totalorder %s2911_s19, 1 }
   0xa   : > { %s3778_s20 = scalar_select %p3416_p1, 1, 0 }
   0xb   : > { %s3779_s21 = scalar_select %p3420_p2, 1, 0 }
   0xc   : > { %p3426_p4 = por %p3416_p1, %p54_p0  ;;  %p2912_p5 = scmp.ge.s32.totalorder %s3348_s17, 1 }
   0xd   : > { %p3431_p6 = por %p138_p3, %p54_p0  ;;  %p145_p7 = scmp.lt.s32.totalorder %s3348_s17, 3 }
   0xe   : > { %s3780_s22 = scalar_select %p3426_p4, 1, 0 }
   0xf   : > { %s3781_s23 = scalar_select %p3431_p6, 1, 0 }
  0x10   : > { %p3436_p8 = pnand %p2912_p5, %p145_p7  ;;  %s3350_s25 = smov [#allocation5]  }
  0x11   : > { %s161_s26 = sshll.u32 %s3350_s25, 4  ;;  %s29_s28 = sadd.s32 1, %s3344_s16  ;;  %s162_s26 = int_to_ptr.vmem [resolvable:$true] %s161_s26 }
  0x12   : > { %s3782_s24 = scalar_select %p3436_p8, 1, 0 }
  0x13   : > { %p3130_p9 = pneg %p3436_p8  ;;  %s3204_s4 = scalar_lea.hbm %s3771_s1, 2048 }
  0x14   : > { %p3205_p12 = scmp.ne.s32.totalorder %s3771_s1, %s3204_s4  ;;  %p3211_p5 = scmp.lt.u32.totalorder %s3204_s4, %s3771_s1 }
  0x15   : > { %p3445_p11 = pnand %p3130_p9, %p3416_p1 }
  0x17   : > { %p3206_p13 = pneg %p3445_p11 }
  0x19   : > { %p3207_p0 = pnand %p3206_p13, %p3205_p12 }
  0x1b   : > { %p3208_p3 = pneg %p3207_p0 }
  0x1d   : > { %p3213_p7 = pnand %p3211_p5, %p3208_p3 }
  0x1f   : > { %3216 = shalt.err (!%p3213_p7)
}
  0x20   : > { %s3217_s9 = scalar_lea.vmem %s162_s26, 2048  ;;  %p3225_p1 = scmp.lt.s32.totalorder %s162_s26, %s162_s26 }
  0x21   : > { %p3218_p9 = scmp.ne.s32.totalorder %s162_s26, %s3217_s9  ;;  %p3226_p4 = scmp.lt.s32.totalorder %s3217_s9, %s3217_s9 }
  0x23   : > { %p3220_p10 = pnand %p3218_p9, %p3206_p13  ;;  %p3227_p8 = por %p3226_p4, %p3225_p1 }
  0x25   : > { %p3221_p6 = pneg %p3220_p10 }
  0x27   : > { %p3228_p2 = pnand %p3227_p8, %p3221_p6 }
  0x29   : > { %3231 = shalt.err (!%p3228_p2)
}
  0x2a   : > { %s3351_s10 = smov 128   ;;  %s3352_s11 = smov 8  }
  0x2b   : > { %3133 = dma.hbm_to_vmem [thread:$0]  (!%p3445_p11), %s3771_s1, 2048, %s162_s26, [#allocation6], %s3351_s10, %s3351_s10, %s3352_s11  }
  0x2c   : > { %p30_p1 = scmp.ge.s32.totalorder %s29_s28, 2  ;;  %s41_s25 = sadd.s32 1, %s3336_s14 }
  0x2d   : > { %p48_p2 = scmp.ne.s32.totalorder %s3336_s14, %s3332_s13  ;;  %p49_p4 = scmp.eq.s32.totalorder %s3348_s17, 0 }
  0x2e   : > { %s3799_s28 = smov (%p30_p1, %s29_s28), 0  ;;  %p3785_p8 = scmp.ne.s32.totalorder %s3779_s21, 0 }
  0x2f   : > { %p3472_p6 = por %p49_p4, %p48_p2  ;;  %s36_s27 = ssub.s32 %s3344_s16, %s3799_s28 }
  0x30   : > { %p3478_p10 = por %p3785_p8, %p48_p2  ;;  %p3143_p12 = scmp.lt.s32.totalorder %s3348_s17, 2 }
  0x31   : > { %p39_p11 = scmp.eq.s32.totalorder %s36_s27, 0  ;;  %s182_s26 = sand.u32 1, %s3336_s14  }
  0x32   : > { %s2916_s4 = sshll.u32 %s182_s26, 4  ;;  %s2960_s6 = sshll.u32 %s3344_s16, 8 }
  0x33   : > { %s3487_s5 = scalar_select %p39_p11, %s3336_s14, %s41_s25  }
  0x34   : > { %s3493_s9 = scalar_lea.hbm %s3770_s0, %s2960_s6  ;;  %s186_s21 = scalar_lea.vmem [#allocation2], %s2916_s4 }
  0x35   : > { %s194_s10 = sshll.u32 %s186_s21, 4  ;;  %p3499_p13 = pnand %p3143_p12, %p3472_p6  ;;  %s3495_s10 = int_to_ptr.vmem [resolvable:$true] %s194_s10 }
  0x36   : > { %s3503_s18 = scalar_lea.sflag [#allocation3], %s182_s26  ;;  %s3232_s19 = scalar_lea.hbm %s3493_s9, 256 }
  0x37   : > { %p3233_p0 = scmp.ne.s32.totalorder %s3493_s9, %s3232_s19  ;;  %p3234_p3 = pneg %p3499_p13 }
  0x38   : > { %s3237_s29 = scalar_lea.hbm %s3770_s0, 512  ;;  %p3238_p9 = scmp.lt.u32.totalorder %s3493_s9, %s3770_s0 }
  0x39   : > { %p3235_p5 = pnand %p3234_p3, %p3233_p0  ;;  %p3239_p1 = scmp.lt.u32.totalorder %s3237_s29, %s3232_s19 }
  0x3a   : > { %p3241_p4 = scmp.lt.u32.totalorder %s3232_s19, %s3493_s9 }
  0x3b   : > { %p3236_p7 = pneg %p3235_p5  ;;  %p3240_p2 = por %p3239_p1, %p3238_p9 }
  0x3d   : > { %p3242_p6 = por %p3241_p4, %p3240_p2 }
  0x3f   : > { %p3243_p8 = pnand %p3242_p6, %p3236_p7 }
  0x41   : > { %3246 = shalt.err (!%p3243_p8)
}
  0x42   : > { %s3247_s26 = scalar_lea.vmem %s3495_s10, 256  ;;  %s3353_s7 = smov [#allocation2]  }
  0x43   : > { %p3248_p12 = scmp.ne.s32.totalorder %s3495_s10, %s3247_s26  ;;  %s3252_s8 = sshll.u32 %s3353_s7, 4  ;;  %s3253_s8 = int_to_ptr.vmem [resolvable:$false] %s3252_s8 }
  0x44   : > { %s3254_s21 = scalar_lea.vmem %s3253_s8, 512  ;;  %p3255_p5 = scmp.lt.s32.totalorder %s3495_s10, %s3253_s8 }
  0x45   : > { %p3250_p11 = pnand %p3248_p12, %p3234_p3  ;;  %p3256_p9 = scmp.lt.s32.totalorder %s3254_s21, %s3247_s26 }
  0x47   : > { %p3251_p0 = pneg %p3250_p11  ;;  %p3257_p1 = por %p3256_p9, %p3255_p5 }
  0x49   : > { %p3258_p2 = pnand %p3257_p1, %p3251_p0 }
  0x4b   : > { %3261 = shalt.err (!%p3258_p2)
}
  0x4c   : > { %s3354_s19 = smov 64   ;;  %s3355_s25 = smov 4  }
  0x4d   : > { %3137 = dma.hbm_to_vmem [thread:$0]  (!%p3499_p13), %s3493_s9, 256, %s3495_s10, %s3503_s18, %s3354_s19, %s3354_s19, %s3355_s25  }
  0x4e   : > { %p3788_p3 = scmp.ne.s32.totalorder %s3782_s24, 0 }
  0x4f   : > { %s3534_s27 = sand.u32 (!%p3788_p3), 1, %s3332_s13   ;;  %p3789_p7 = scmp.ne.s32.totalorder (!%p3788_p3), %s3780_s22, 0 }
  0x50   : > { %206 = sbr.rel (%p3788_p3) target bundleno = 853 (0x355), region = 32  ;;  %s2920_s29 = sshll.u32 (!%p3788_p3), %s3534_s27, 4 }
  0x51   : > { %s209_s4 = scalar_lea.sflag (!%p3788_p3), [#allocation3], %s3534_s27  ;;  %s212_s6 = scalar_lea.vmem (!%p3788_p3), [#allocation2], %s2920_s29 }
  0x57   : > { %3315 = dma.done.wait (%p3789_p7), %s209_s4, 256  }
  0x58   : > { %3317 = vsyncadd (%p3789_p7), %s209_s4, 4294967040  ;;  %p3790_p13 = scmp.ne.s32.totalorder %s3778_s20, 0 }
  0x5a   : > { %3319 = dma.done.wait (%p3790_p13), [#allocation6], 2048  }
  0x5b   : > { %3321 = vsyncadd (%p3790_p13), [#allocation6], 4294965248  ;;  %v252_v0 = vld [vmem:[%s212_s6 + $0x8] sm:$0xf]  ;;  %v250_v1 = vld [vmem:[%s212_s6] sm:$0xf]  ;;  %v403_v10 = vlaneseq }
  0x5c   : > { %334 = vxpose.xlu1.b32.start.end [1/1] (short) (narrow) %v252_v0, 32  ;;  %270 = vxpose.xlu0.b32.start.end [1/1] (short) (narrow) %v250_v1, 32  ;;  %v253_v2 = vld [vmem:[%s212_s6 + $0xc] sm:$0xf]  ;;  %v251_v3 = vld [vmem:[%s212_s6 + $0x4] sm:$0xf] }
  0x5d   : > { %v3356_v8 = vmov 1983009808   ;;  %v404_v14 = vshrl.u32 %v403_v10, 7  ;;  %v3357_v15 = vmov 1934713408   ;;  %v3358_v38 = vmov 0.0  }
  0x5e   : > { %v401_v9 = vunpack.c.l.s4 %v3356_v8  ;;  %v433_v16 = vunpack.c.l.s4 %v3357_v15  ;;  %vm1998_vm0 = vcmask 261120   ;;  %s2961_s24 = sshll.u32 %s3340_s15, 8  ;;  %s242_s9 = scalar_lea.vmem [#allocation7], %s2920_s29  ;;  %vm2778_vm1 = vcmask 519168  }
  0x5f   : > { %s2798_s10 = sshll.u32 %s242_s9, 4  ;;  %s3719_s26 = scalar_lea.hbm %s3773_s3, %s2961_s24  ;;  %s3721_s10 = int_to_ptr.vmem [resolvable:$true] %s2798_s10 }
  0x60   : > { %v402_v13 = vunpack.c.0.s8 %v401_v9  ;;  %v434_v21 = vunpack.c.0.s8 %v433_v16  ;;  %s2784_s15 = scalar_lea.sflag [#allocation4], %s3534_s27  ;;  %s3262_s7 = scalar_lea.vmem %s3721_s10, 256 }
  0x61   : > { %p3263_p4 = scmp.ne.s32.totalorder %s3721_s10, %s3262_s7  ;;  %s3359_s8 = smov [#allocation7]  }
  0x62   : > { %v3556_v19 = vsub.s32 %v402_v13, %v404_v14  ;;  %v3560_v29 = vsub.s32 %v434_v21, %v404_v14  ;;  %s3266_s21 = sshll.u32 %s3359_s8, 4  ;;  %s3267_s21 = int_to_ptr.vmem [resolvable:$false] %s3266_s21 }
  0x63   : > { %p3264_p6 = pnand %p3263_p4, %p3478_p10  ;;  %s3268_s19 = scalar_lea.vmem %s3267_s21, 512 }
  0x64   : > { %p3269_p12 = scmp.lt.s32.totalorder %s3721_s10, %s3267_s21  ;;  %p3270_p11 = scmp.lt.s32.totalorder %s3268_s19, %s3262_s7 }
  0x65   : > { %p3265_p8 = pneg %p3264_p6 }
  0x66   : > { %p3271_p0 = por %p3270_p11, %p3269_p12 }
  0x68   : > { %p3272_p5 = pnand %p3271_p0, %p3265_p8 }
  0x69   : > { %366 = vxpose.xlu1.b32.start.end [1/1] (short) (narrow) %v253_v2, 32  ;;  %302 = vxpose.xlu0.b32.start.end [1/1] (short) (narrow) %v251_v3, 32 }
  0xdc   : > { %v350_v4 = vpop.trf.xlu1  ;;  %v286_v5 = vpop.trf.xlu0 }
  0xdd   : > { %v398_v20 = vcombine.low %v286_v5, %v350_v4  ;;  %v399_v26 = vcombine.high %v286_v5, %v350_v4 }
  0xdf   : > { %v406_v27 = vrot.slane %v398_v20, %v3556_v19  ;;  %v413_v35 = vrot.slane %v399_v26, %v3556_v19 }
  0xe0   : > { %v351_v6 = vpop.trf.xlu1  ;;  %v287_v7 = vpop.trf.xlu0 }
  0xe1   : > { %v466_v42 = vcombine.low %v287_v7, %v351_v6  ;;  %v467_v52 = vcombine.high %v287_v7, %v351_v6 }
  0xe3   : > { %v474_v47 = vrot.slane %v466_v42, %v3556_v19  ;;  %v481_v59 = vrot.slane %v467_v52, %v3556_v19  ;;  %v255_v52 = vld [vmem:[#allocation5 + $0x8] sm:$0xff] }
  0xe4   : > { %v3548_v11 = vpop.trf.xlu1  ;;  %v3550_v12 = vpop.trf.xlu0 }
  0xe5   : > { %v534_v0 = vcombine.low %v3550_v12, %v3548_v11  ;;  %v535_v10 = vcombine.high %v3550_v12, %v3548_v11 }
  0xe7   : > { %v542_v5 = vrot.slane %v534_v0, %v3556_v19  ;;  %v265_v0 = vld [vmem:[#allocation5 + $0x58] sm:$0xff] }
  0xe8   : > { %v3552_v17 = vpop.trf.xlu1  ;;  %v3554_v18 = vpop.trf.xlu0 }
  0xec   : > { %v382_v22 = vpop.trf.xlu1  ;;  %v318_v23 = vpop.trf.xlu0 }
  0xed   : > { %v414_v24 = vcombine.low %v318_v23, %v382_v22  ;;  %v415_v25 = vcombine.high %v318_v23, %v382_v22  ;;  %v549_v22 = vrot.slane %v535_v10, %v3556_v19 }
  0xef   : > { %v422_v28 = vrot.slane %v414_v24, %v3556_v19  ;;  %v429_v30 = vrot.slane %v415_v25, %v3556_v19  ;;  %v602_v25 = vcombine.low %v3554_v18, %v3552_v17 }
  0xf0   : > { %v383_v33 = vpop.trf.xlu1  ;;  %v319_v34 = vpop.trf.xlu0 }
  0xf1   : > { %v430_v31 = vcombine.low %v406_v27, %v422_v28  ;;  %v431_v32 = vcombine.high %v406_v27, %v422_v28  ;;  %v482_v37 = vcombine.low %v319_v34, %v383_v33  ;;  %v446_v41 = vcombine.low %v413_v35, %v429_v30 }
  0xf2   : > { %v447_v46 = vcombine.high %v413_v35, %v429_v30  ;;  %v483_v48 = vcombine.high %v319_v34, %v383_v33 }
  0xf3   : > { %v438_v36 = vrot.slane %v430_v31, %v3560_v29  ;;  %v445_v40 = vrot.slane %v431_v32, %v3560_v29  ;;  %v490_v43 = vrot.slane %v482_v37, %v3556_v19  ;;  %v454_v45 = vrot.slane %v446_v41, %v3560_v29 }
  0xf4   : > { %v461_v50 = vrot.slane %v447_v46, %v3560_v29  ;;  %v497_v53 = vrot.slane %v483_v48, %v3556_v19  ;;  %v384_v57 = vpop.trf.xlu1  ;;  %v320_v58 = vpop.trf.xlu0  ;;  %v610_v31 = vrot.slane %v602_v25, %v3556_v19 }
  0xf5   : > { %670 = vxpose.xlu0.b32.start.end [1/1] (short) (narrow) %v438_v36, 8  ;;  %v462_v39 = vcombine.high %v438_v36, %v3358_v38  ;;  %v463_v44 = vcombine.high %v445_v40, %v3358_v38  ;;  %v464_v49 = vcombine.high %v454_v45, %v3358_v38  ;;  %v498_v51 = vcombine.low %v474_v47, %v490_v43 }
  0xf6   : > { %v465_v54 = vcombine.high %v461_v50, %v3358_v38  ;;  %v499_v56 = vcombine.high %v474_v47, %v490_v43  ;;  %v550_v60 = vcombine.low %v320_v58, %v384_v57  ;;  %v514_v63 = vcombine.low %v481_v59, %v497_v53 }
  0xf7   : > { %702 = vxpose.xlu1.b32.start.end [1/1] (short) (narrow) %v462_v39, 8  ;;  %v506_v55 = vrot.slane %v498_v51, %v3560_v29  ;;  %v515_v4 = vcombine.high %v481_v59, %v497_v53  ;;  %v551_v6 = vcombine.high %v320_v58, %v384_v57  ;;  %v603_v36 = vcombine.high %v3554_v18, %v3552_v17  ;;  %v258_v51 = vld [vmem:[#allocation5 + $0x20] sm:$0xff]  ;;  %v259_v53 = vld [vmem:[#allocation5 + $0x28] sm:$0xff]  ;;  %v261_v57 = vld [vmem:[#allocation5 + $0x38] sm:$0xff] }
  0xf8   : > { %v513_v62 = vrot.slane %v499_v56, %v3560_v29  ;;  %v558_v1 = vrot.slane %v550_v60, %v3556_v19  ;;  %v522_v3 = vrot.slane %v514_v63, %v3560_v29  ;;  %v385_v20 = vpop.trf.xlu1  ;;  %v321_v21 = vpop.trf.xlu0  ;;  %v257_v56 = vld [vmem:[#allocation5 + $0x18] sm:$0xff]  ;;  %v262_v58 = vld [vmem:[#allocation5 + $0x40] sm:$0xff]  ;;  %v263_v60 = vld [vmem:[#allocation5 + $0x48] sm:$0xff] }
  0xf9   : > { %734 = vxpose.xlu0.b32.start.end [1/1] (short) (narrow) %v445_v40, 8  ;;  %v530_v61 = vcombine.high %v506_v55, %v3358_v38  ;;  %v529_v8 = vrot.slane %v515_v4, %v3560_v29  ;;  %v565_v13 = vrot.slane %v551_v6, %v3556_v19  ;;  %v618_v23 = vcombine.low %v321_v21, %v385_v20  ;;  %v266_v59 = vld [vmem:[#allocation5 + $0x60] sm:$0xff]  ;;  %v268_v63 = vld [vmem:[#allocation5 + $0x70] sm:$0xff] }
  0xfa   : > { %v531_v2 = vcombine.high %v513_v62, %v3358_v38  ;;  %v532_v7 = vcombine.high %v522_v3, %v3358_v38  ;;  %v566_v9 = vcombine.low %v542_v5, %v558_v1  ;;  %v567_v16 = vcombine.high %v542_v5, %v558_v1  ;;  %v269_v1 = vld [vmem:[#allocation5 + $0x78] sm:$0xff] }
  0xfb   : > { %766 = vxpose.xlu1.b32.start.end [1/1] (short) (narrow) %v463_v44, 8  ;;  %v533_v14 = vcombine.high %v529_v8, %v3358_v38  ;;  %v582_v12 = vcombine.low %v549_v22, %v565_v13  ;;  %v626_v26 = vrot.slane %v618_v23, %v3556_v19  ;;  %v583_v30 = vcombine.high %v549_v22, %v565_v13 }
  0xfc   : > { %v574_v15 = vrot.slane %v566_v9, %v3560_v29  ;;  %v581_v11 = vrot.slane %v567_v16, %v3560_v29  ;;  %v619_v32 = vcombine.high %v321_v21, %v385_v20  ;;  %v617_v42 = vrot.slane %v603_v36, %v3556_v19 }
  0xfd   : > { %798 = vxpose.xlu0.b32.start.end [1/1] (short) (narrow) %v454_v45, 8  ;;  %v590_v28 = vrot.slane %v582_v12, %v3560_v29  ;;  %v597_v34 = vrot.slane %v583_v30, %v3560_v29  ;;  %v634_v35 = vcombine.low %v610_v31, %v626_v26  ;;  %v635_v41 = vcombine.high %v610_v31, %v626_v26 }
  0xfe   : > { %v598_v24 = vcombine.high %v574_v15, %v3358_v38  ;;  %v599_v27 = vcombine.high %v581_v11, %v3358_v38  ;;  %v633_v37 = vrot.slane %v619_v32, %v3556_v19 }
  0xff   : > { %830 = vxpose.xlu1.b32.start.end [1/1] (short) (narrow) %v464_v49, 8  ;;  %v600_v33 = vcombine.high %v590_v28, %v3358_v38  ;;  %v601_v39 = vcombine.high %v597_v34, %v3358_v38  ;;  %v642_v40 = vrot.slane %v634_v35, %v3560_v29  ;;  %v649_v44 = vrot.slane %v635_v41, %v3560_v29 }
 0x100   : > { %v650_v45 = vcombine.low %v617_v42, %v633_v37  ;;  %v651_v46 = vcombine.high %v617_v42, %v633_v37 }
 0x101   : > { %862 = vxpose.xlu0.b32.start.end [1/1] (short) (narrow) %v461_v50, 8  ;;  %v666_v43 = vcombine.high %v642_v40, %v3358_v38  ;;  %v667_v17 = vcombine.high %v649_v44, %v3358_v38  ;;  %v254_v50 = vld [vmem:[#allocation5] sm:$0xff] }
 0x102   : > { %v658_v18 = vrot.slane %v650_v45, %v3560_v29  ;;  %v665_v48 = vrot.slane %v651_v46, %v3560_v29 }
 0x103   : > { %894 = vxpose.xlu1.b32.start.end [1/1] (short) (narrow) %v465_v54, 8  ;;  %v256_v54 = vld [vmem:[#allocation5 + $0x10] sm:$0xff] }
 0x104   : > { %v668_v47 = vcombine.high %v658_v18, %v3358_v38  ;;  %v669_v49 = vcombine.high %v665_v48, %v3358_v38 }
 0x105   : > { %926 = vxpose.xlu0.b32.start.end [1/1] (short) (narrow) %v506_v55, 8  ;;  %v260_v55 = vld [vmem:[#allocation5 + $0x30] sm:$0xff] }
 0x107   : > { %958 = vxpose.xlu1.b32.start.end [1/1] (short) (narrow) %v530_v61, 8  ;;  %v267_v61 = vld [vmem:[#allocation5 + $0x68] sm:$0xff] }
 0x109   : > { %990 = vxpose.xlu0.b32.start.end [1/1] (short) (narrow) %v513_v62, 8  ;;  %v264_v62 = vld [vmem:[#allocation5 + $0x50] sm:$0xff] }
 0x10b   : > { %1022 = vxpose.xlu1.b32.start.end [1/1] (short) (narrow) %v531_v2, 8 }
 0x10d   : > { %1054 = vxpose.xlu0.b32.start.end [1/1] (short) (narrow) %v522_v3, 8 }
 0x10f   : > { %1086 = vxpose.xlu1.b32.start.end [1/1] (short) (narrow) %v532_v7, 8 }
 0x111   : > { %1118 = vxpose.xlu0.b32.start.end [1/1] (short) (narrow) %v529_v8, 8 }
 0x113   : > { %1150 = vxpose.xlu1.b32.start.end [1/1] (short) (narrow) %v533_v14, 8 }
 0x115   : > { %1182 = vxpose.xlu0.b32.start.end [1/1] (short) (narrow) %v574_v15, 8 }
 0x117   : > { %1214 = vxpose.xlu1.b32.start.end [1/1] (short) (narrow) %v598_v24, 8 }
 0x119   : > { %1246 = vxpose.xlu0.b32.start.end [1/1] (short) (narrow) %v581_v11, 8 }
 0x11b   : > { %1278 = vxpose.xlu1.b32.start.end [1/1] (short) (narrow) %v599_v27, 8 }
 0x11d   : > { %1310 = vxpose.xlu0.b32.start.end [1/1] (short) (narrow) %v590_v28, 8 }
 0x11f   : > { %1342 = vxpose.xlu1.b32.start.end [1/1] (short) (narrow) %v600_v33, 8 }
 0x121   : > { %1374 = vxpose.xlu0.b32.start.end [1/1] (short) (narrow) %v597_v34, 8 }
 0x123   : > { %1406 = vxpose.xlu1.b32.start.end [1/1] (short) (narrow) %v601_v39, 8 }
 0x125   : > { %1438 = vxpose.xlu0.b32.start.end [1/1] (short) (narrow) %v642_v40, 8 }
 0x127   : > { %1470 = vxpose.xlu1.b32.start.end [1/1] (short) (narrow) %v666_v43, 8 }
 0x129   : > { %1502 = vxpose.xlu0.b32.start.end [1/1] (short) (narrow) %v649_v44, 8 }
 0x12b   : > { %1534 = vxpose.xlu1.b32.start.end [1/1] (short) (narrow) %v667_v17, 8 }
 0x12d   : > { %1566 = vxpose.xlu0.b32.start.end [1/1] (short) (narrow) %v658_v18, 8 }
 0x12f   : > { %1598 = vxpose.xlu1.b32.start.end [1/1] (short) (narrow) %v668_v47, 8 }
 0x131   : > { %1630 = vxpose.xlu0.b32.start.end [1/1] (short) (narrow) %v665_v48, 8 }
 0x133   : > { %1662 = vxpose.xlu1.b32.start.end [1/1] (short) (narrow) %v669_v49, 8 }
 0x135   : > { %1966 = vxpose.xlu0.b32.start [1/4] (short) (narrow) %v254_v50, 64 }
 0x137   : > { %2128 = vxpose.xlu1.b32.start [1/4] (short) (narrow) %v258_v51, 64 }
 0x139   : > { %1967 = vxpose.xlu0.b32.cont [2/4] (short) (narrow) %v255_v52, 64 }
 0x13b   : > { %2129 = vxpose.xlu1.b32.cont [2/4] (short) (narrow) %v259_v53, 64 }
 0x13d   : > { %1968 = vxpose.xlu0.b32.cont [3/4] (short) (narrow) %v256_v54, 64 }
 0x13f   : > { %2130 = vxpose.xlu1.b32.cont [3/4] (short) (narrow) %v260_v55, 64 }
 0x141   : > { %1969 = vxpose.xlu0.b32.end [4/4] (short) (narrow) %v257_v56, 64 }
 0x143   : > { %2131 = vxpose.xlu1.b32.end [4/4] (short) (narrow) %v261_v57, 64 }
 0x152   : > { %2289 = vxpose.xlu0.b32.start [1/4] (short) (narrow) %v262_v58, 64 }
 0x154   : > { %2450 = vxpose.xlu1.b32.start [1/4] (short) (narrow) %v266_v59, 64 }
 0x156   : > { %2290 = vxpose.xlu0.b32.cont [2/4] (short) (narrow) %v263_v60, 64 }
 0x158   : > { %2451 = vxpose.xlu1.b32.cont [2/4] (short) (narrow) %v267_v61, 64 }
 0x15a   : > { %2291 = vxpose.xlu0.b32.cont [3/4] (short) (narrow) %v264_v62, 64 }
 0x15c   : > { %2452 = vxpose.xlu1.b32.cont [3/4] (short) (narrow) %v268_v63, 64 }
 0x15e   : > { %2292 = vxpose.xlu0.b32.end [4/4] (short) (narrow) %v265_v0, 64 }
 0x160   : > { %2453 = vxpose.xlu1.b32.end [4/4] (short) (narrow) %v269_v1, 64 }
 0x175   : > { %v686_v2 = vpop.trf.xlu0 }
 0x177   : > { %v718_v3 = vpop.trf.xlu1 }
 0x179   : > { %v750_v4 = vpop.trf.xlu0 }
 0x17a   : > { %v1694_v11 = vcombine.low %v686_v2, %v750_v4 }
 0x17b   : > { %v782_v5 = vpop.trf.xlu1 }
 0x17c   : > { %v1702_v21 = vcombine.low %v718_v3, %v782_v5  ;;  %v3629_v33 = vrot.slane %v1694_v11, %v3556_v19 }
 0x17d   : > { %v814_v6 = vpop.trf.xlu0 }
 0x17e   : > { %v3620_v27 = vrot.slane %v1702_v21, %v3556_v19 }
 0x17f   : > { %v846_v7 = vpop.trf.xlu1 }
 0x180   : > { %v1726_v39 = vcombine.low %v3629_v33, %v3620_v27 }
 0x181   : > { %v878_v8 = vpop.trf.xlu0 }
 0x182   : > { %v1710_v22 = vcombine.low %v814_v6, %v878_v8  ;;  %v1734_v18 = vrot.slane %v1726_v39, %v3560_v29 }
 0x183   : > { %v910_v9 = vpop.trf.xlu1 }
 0x184   : > { %v1718_v16 = vcombine.low %v846_v7, %v910_v9  ;;  %v3623_v28 = vrot.slane %v1710_v22, %v3556_v19 }
 0x185   : > { %v942_v10 = vpop.trf.xlu0 }
 0x186   : > { %v3617_v12 = vrot.slane %v1718_v16, %v3556_v19 }
 0x187   : > { %v974_v13 = vpop.trf.xlu1 }
 0x188   : > { %v1742_v34 = vcombine.low %v3623_v28, %v3617_v12  ;;  %v1743_v11 = vcombine.high %v3623_v28, %v3617_v12 }
 0x189   : > { %v1006_v14 = vpop.trf.xlu0 }
 0x18a   : > { %v1762_v25 = vcombine.low %v942_v10, %v1006_v14  ;;  %v1750_v45 = vrot.slane %v1742_v34, %v3560_v29  ;;  %v1757_v28 = vrot.slane %v1743_v11, %v3560_v29 }
 0x18b   : > { %v1038_v15 = vpop.trf.xlu1 }
 0x18c   : > { %v1770_v23 = vcombine.low %v974_v13, %v1038_v15  ;;  %v3634_v35 = vrot.slane %v1762_v25, %v3556_v19  ;;  %v1758_v49 = vcombine.low %v1734_v18, %v1750_v45  ;;  %v1759_v51 = vcombine.high %v1734_v18, %v1750_v45 }
 0x18d   : > { %v1070_v20 = vpop.trf.xlu0 }
 0x18e   : > { %v3626_v30 = vrot.slane %v1770_v23, %v3556_v19 }
 0x18f   : > { %v1102_v24 = vpop.trf.xlu1 }
 0x190   : > { %v1794_v40 = vcombine.low %v3634_v35, %v3626_v30  ;;  %v1795_v25 = vcombine.high %v3634_v35, %v3626_v30 }
 0x191   : > { %v1134_v26 = vpop.trf.xlu0 }
 0x192   : > { %v1778_v31 = vcombine.low %v1070_v20, %v1134_v26  ;;  %v1802_v46 = vrot.slane %v1794_v40, %v3560_v29  ;;  %v1809_v30 = vrot.slane %v1795_v25, %v3560_v29 }
 0x193   : > { %v1166_v32 = vpop.trf.xlu1 }
 0x194   : > { %v1786_v36 = vcombine.low %v1102_v24, %v1166_v32  ;;  %v1785_v41 = vrot.slane %v1778_v31, %v3556_v19  ;;  %v1727_v24 = vcombine.high %v3629_v33, %v3620_v27 }
 0x195   : > { %v1198_v37 = vpop.trf.xlu0 }
 0x196   : > { %v1793_v42 = vrot.slane %v1786_v36, %v3556_v19  ;;  %v1741_v12 = vrot.slane %v1727_v24, %v3560_v29 }
 0x197   : > { %v1230_v43 = vpop.trf.xlu1 }
 0x198   : > { %v1810_v44 = vcombine.low %v1785_v41, %v1793_v42  ;;  %v1811_v15 = vcombine.high %v1785_v41, %v1793_v42 }
 0x199   : > { %v1262_v17 = vpop.trf.xlu0 }
 0x19a   : > { %v1818_v47 = vrot.slane %v1810_v44, %v3560_v29  ;;  %v1830_v4 = vcombine.low %v1198_v37, %v1262_v17  ;;  %v1825_v37 = vrot.slane %v1811_v15, %v3560_v29 }
 0x19b   : > { %v1294_v48 = vpop.trf.xlu1 }
 0x19c   : > { %v1826_v50 = vcombine.low %v1802_v46, %v1818_v47  ;;  %v1827_v52 = vcombine.high %v1802_v46, %v1818_v47  ;;  %v1838_v0 = vcombine.low %v1230_v43, %v1294_v48  ;;  %v1837_v16 = vrot.slane %v1830_v4, %v3556_v19 }
 0x19d   : > { %v1326_v53 = vpop.trf.xlu0  ;;  %v1828_v47 = vcombine.low %v1809_v30, %v1825_v37  ;;  %v1829_v48 = vcombine.high %v1809_v30, %v1825_v37 }
 0x19e   : > { %v3090_v54 = vpack.c.bf16 %v1826_v50, %v1758_v49  ;;  %v3098_v55 = vpack.c.bf16 %v1827_v52, %v1759_v51  ;;  %v1845_v8 = vrot.slane %v1838_v0, %v3556_v19 }
 0x19f   : > { %v1358_v56 = vpop.trf.xlu1 }
 0x1a0   : > { %3091 = vmatprep.subr.bf16.mxu0 %v3090_v54  ;;  %3099 = vmatprep.subr.bf16.mxu1 %v3098_v55  ;;  %v1862_v26 = vcombine.low %v1837_v16, %v1845_v8  ;;  %v1863_v17 = vcombine.high %v1837_v16, %v1845_v8 }
 0x1a1   : > { %3093 = vmatpush3.bf16.msra.mxu0 %v3090_v54  ;;  %3101 = vmatpush3.bf16.msra.mxu1 %v3098_v55  ;;  %v1390_v57 = vpop.trf.xlu0  ;;  %v1761_v54 = vcombine.high %v1741_v12, %v1757_v28 }
 0x1a2   : > { %v1846_v1 = vcombine.low %v1326_v53, %v1390_v57  ;;  %v1870_v35 = vrot.slane %v1862_v26, %v3560_v29  ;;  %v1760_v53 = vcombine.low %v1741_v12, %v1757_v28 }
 0x1a3   : > { %v1422_v58 = vpop.trf.xlu1 }
 0x1a4   : > { %v1854_v62 = vcombine.low %v1358_v56, %v1422_v58  ;;  %v1853_v9 = vrot.slane %v1846_v1, %v3556_v19 }
 0x1a5   : > { %v1454_v59 = vpop.trf.xlu0 }
 0x1a6   : > { %v1861_v5 = vrot.slane %v1854_v62, %v3556_v19 }
 0x1a7   : > { %v1486_v60 = vpop.trf.xlu1 }
 0x1a8   : > { %v1878_v20 = vcombine.low %v1853_v9, %v1861_v5  ;;  %v1879_v42 = vcombine.high %v1853_v9, %v1861_v5 }
 0x1a9   : > { %v1518_v61 = vpop.trf.xlu0 }
 0x1aa   : > { %v1898_v7 = vcombine.low %v1454_v59, %v1518_v61  ;;  %v1886_v39 = vrot.slane %v1878_v20, %v3560_v29  ;;  %v1893_v56 = vrot.slane %v1879_v42, %v3560_v29  ;;  %v3114_v61 = vpack.c.bf16 %v1829_v48, %v1761_v54 }
 0x1ab   : > { %v1550_v63 = vpop.trf.xlu1 }
 0x1ac   : > { %v1906_v3 = vcombine.low %v1486_v60, %v1550_v63  ;;  %v1905_v22 = vrot.slane %v1898_v7, %v3556_v19  ;;  %v1894_v18 = vcombine.low %v1870_v35, %v1886_v39  ;;  %v1895_v51 = vcombine.high %v1870_v35, %v1886_v39 }
 0x1ad   : > { %v1582_v2 = vpop.trf.xlu0  ;;  %v3106_v60 = vpack.c.bf16 %v1828_v47, %v1760_v53  ;;  %v1877_v63 = vrot.slane %v1863_v17, %v3560_v29 }
 0x1ae   : > { %v1913_v13 = vrot.slane %v1906_v3, %v3556_v19 }
 0x1af   : > { %v1614_v6 = vpop.trf.xlu1  ;;  %v1896_v3 = vcombine.low %v1877_v63, %v1893_v56  ;;  %v1897_v4 = vcombine.high %v1877_v63, %v1893_v56 }
 0x1b0   : > { %v1930_v32 = vcombine.low %v1905_v22, %v1913_v13  ;;  %v1931_v43 = vcombine.high %v1905_v22, %v1913_v13 }
 0x1b1   : > { %v1646_v10 = vpop.trf.xlu0 }
 0x1b2   : > { %v1914_v14 = vcombine.low %v1582_v2, %v1646_v10  ;;  %v1938_v44 = vrot.slane %v1930_v32, %v3560_v29  ;;  %v1945_v57 = vrot.slane %v1931_v43, %v3560_v29 }
 0x1b3   : > { %v1678_v21 = vpop.trf.xlu1 }
 0x1b4   : > { %v1922_v23 = vcombine.low %v1614_v6, %v1678_v21  ;;  %v1921_v34 = vrot.slane %v1914_v14, %v3556_v19 }
 0x1b5   : > { %v1982_v31 = vpop.trf.xlu0 }
 0x1b6   : > { %v1929_v36 = vrot.slane %v1922_v23, %v3556_v19  ;;  %3018 = vmatprep.mubr.msk.f32.mxu0 %vm1998_vm0, %v1982_v31 }
 0x1b7   : > { %v2144_v27 = vpop.trf.xlu1 }
 0x1b8   : > { %v1946_v33 = vcombine.low %v1921_v34, %v1929_v36  ;;  %v1947_v40 = vcombine.high %v1921_v34, %v1929_v36  ;;  %3038 = vmatprep.mubr.msk.f32.mxu1 %vm1998_vm0, %v2144_v27 }
 0x1b9   : > { %v1983_v41 = vpop.trf.xlu0 }
 0x1ba   : > { %v1954_v45 = vrot.slane %v1946_v33, %v3560_v29  ;;  %v1961_v49 = vrot.slane %v1947_v40, %v3560_v29 }
 0x1bb   : > { %v2145_v46 = vpop.trf.xlu1 }
 0x1bc   : > { %v1962_v50 = vcombine.low %v1938_v44, %v1954_v45  ;;  %v1963_v52 = vcombine.high %v1938_v44, %v1954_v45  ;;  %v1964_v0 = vcombine.low %v1945_v57, %v1961_v49  ;;  %v1965_v1 = vcombine.high %v1945_v57, %v1961_v49 }
 0x1bd   : > { %v1984_v55 = vpop.trf.xlu0 }
 0x1be   : > { %v3094_v58 = vpack.c.bf16 %v1962_v50, %v1894_v18  ;;  %v3102_v59 = vpack.c.bf16 %v1963_v52, %v1895_v51  ;;  %v3110_v6 = vpack.c.bf16 %v1964_v0, %v1896_v3  ;;  %v3118_v7 = vpack.c.bf16 %v1965_v1, %v1897_v4 }
 0x1bf   : > { %v2146_v62 = vpop.trf.xlu1 }
 0x1c0   : > { %3095 = vmatprep.subr.bf16.mxu0 %v3094_v58  ;;  %3103 = vmatprep.subr.bf16.mxu1 %v3102_v59 }
 0x1c1   : > { %3097 = vmatpush3.bf16.msra.mxu0 %v3094_v58  ;;  %3105 = vmatpush3.bf16.msra.mxu1 %v3102_v59  ;;  %v1985_v2 = vpop.trf.xlu0 }
 0x1c2   : > { %3107 = vmatprep.subr.bf16.mxu0 %v3106_v60  ;;  %3115 = vmatprep.subr.bf16.mxu1 %v3114_v61 }
 0x1c3   : > { %v2147_v5 = vpop.trf.xlu1 }
 0x1c4   : > { %3019 = vmatmul.mubr.msk.f32.vlgmr.msra.gmra.mrb[0].mxu0 %vm1998_vm0, %v1983_v41  ;;  %3039 = vmatmul.mubr.msk.f32.vlgmr.msra.gmra.mrb[0].mxu1 %vm1998_vm0, %v2145_v46 }
 0x1c5   : > { %3109 = vmatpush3.bf16.msra.mxu0 %v3106_v60  ;;  %3117 = vmatpush3.bf16.msra.mxu1 %v3114_v61  ;;  %v1986_v8 = vpop.trf.xlu0 }
 0x1c6   : > { %3111 = vmatprep.subr.bf16.mxu0 %v3110_v6  ;;  %3119 = vmatprep.subr.bf16.mxu1 %v3118_v7 }
 0x1c7   : > { %3021 = vmatprep.mubr.msk.f32.mxu0 %vm1998_vm0, %v1984_v55  ;;  %3041 = vmatprep.mubr.msk.f32.mxu1 %vm1998_vm0, %v2146_v62  ;;  %v2148_v9 = vpop.trf.xlu1 }
 0x1c8   : > { %3022 = vmatmul.mubr.msk.f32.gmra.mrb[2].mxu0 %vm1998_vm0, %v1985_v2  ;;  %3042 = vmatmul.mubr.msk.f32.gmra.mrb[2].mxu1 %vm1998_vm0, %v2147_v5 }
 0x1c9   : > { %3113 = vmatpush3.bf16.msra.mxu0 %v3110_v6  ;;  %3121 = vmatpush3.bf16.msra.mxu1 %v3118_v7  ;;  %v1987_v10 = vpop.trf.xlu0 }
 0x1ca   : > { %3024 = vmatprep.mubr.msk.f32.mxu0 %vm1998_vm0, %v1986_v8  ;;  %3044 = vmatprep.mubr.msk.f32.mxu1 %vm1998_vm0, %v2148_v9 }
 0x1cb   : > { %v2149_v13 = vpop.trf.xlu1 }
 0x1cc   : > { %3025 = vmatmul.mubr.msk.f32.gmra.mrb[4].mxu0 %vm1998_vm0, %v1987_v10  ;;  %3045 = vmatmul.mubr.msk.f32.gmra.mrb[4].mxu1 %vm1998_vm0, %v2149_v13 }
 0x1cd   : > { %v1988_v14 = vpop.trf.xlu0 }
 0x1ce   : > { %3027 = vmatprep.mubr.msk.f32.mxu0 %vm1998_vm0, %v1988_v14 }
 0x1cf   : > { %v2150_v15 = vpop.trf.xlu1 }
 0x1d0   : > { %3047 = vmatprep.mubr.msk.f32.mxu1 %vm1998_vm0, %v2150_v15  ;;  %v2773_v15 = vld [vmem:[%s3772_s2] sm:$0xf] }
 0x1d1   : > { %v1989_v16 = vpop.trf.xlu0 }
 0x1d2   : > { %3028 = vmatmul.mubr.msk.f32.gmra.mrb[6].mxu0 %vm1998_vm0, %v1989_v16 }
 0x1d3   : > { %v2151_v20 = vpop.trf.xlu1 }
 0x1d4   : > { %3048 = vmatmul.mubr.msk.f32.gmra.mrb[6].mxu1 %vm1998_vm0, %v2151_v20 }
 0x1d5   : > { %v2305_v21 = vpop.trf.xlu0 }
 0x1d6   : > { %3058 = vmatprep.mubr.msk.f32.mxu0 %vm1998_vm0, %v2305_v21 }
 0x1d7   : > { %v2466_v22 = vpop.trf.xlu1 }
 0x1d8   : > { %3078 = vmatprep.mubr.msk.f32.mxu1 %vm1998_vm0, %v2466_v22 }
 0x1d9   : > { %v2306_v23 = vpop.trf.xlu0 }
 0x1da   : > { %3059 = vmatmul.mubr.msk.f32.vlgmr.msra.gmra.mrb[8].mxu0 %vm1998_vm0, %v2306_v23 }
 0x1db   : > { %v2467_v24 = vpop.trf.xlu1 }
 0x1dc   : > { %3079 = vmatmul.mubr.msk.f32.vlgmr.msra.gmra.mrb[8].mxu1 %vm1998_vm0, %v2467_v24 }
 0x1dd   : > { %v2307_v11 = vpop.trf.xlu0 }
 0x1de   : > { %3061 = vmatprep.mubr.msk.f32.mxu0 %vm1998_vm0, %v2307_v11 }
 0x1df   : > { %v2468_v25 = vpop.trf.xlu1 }
 0x1e0   : > { %3081 = vmatprep.mubr.msk.f32.mxu1 %vm1998_vm0, %v2468_v25 }
 0x1e1   : > { %v2308_v26 = vpop.trf.xlu0 }
 0x1e2   : > { %3062 = vmatmul.mubr.msk.f32.gmra.mrb[10].mxu0 %vm1998_vm0, %v2308_v26 }
 0x1e3   : > { %v2469_v31 = vpop.trf.xlu1 }
 0x1e4   : > { %3082 = vmatmul.mubr.msk.f32.gmra.mrb[10].mxu1 %vm1998_vm0, %v2469_v31 }
 0x1e5   : > { %v2309_v32 = vpop.trf.xlu0 }
 0x1e6   : > { %3064 = vmatprep.mubr.msk.f32.mxu0 %vm1998_vm0, %v2309_v32 }
 0x1e7   : > { %v2470_v34 = vpop.trf.xlu1 }
 0x1e8   : > { %3084 = vmatprep.mubr.msk.f32.mxu1 %vm1998_vm0, %v2470_v34 }
 0x1e9   : > { %v2310_v36 = vpop.trf.xlu0 }
 0x1ea   : > { %3065 = vmatmul.mubr.msk.f32.gmra.mrb[12].mxu0 %vm1998_vm0, %v2310_v36 }
 0x1eb   : > { %v2471_v37 = vpop.trf.xlu1 }
 0x1ec   : > { %3085 = vmatmul.mubr.msk.f32.gmra.mrb[12].mxu1 %vm1998_vm0, %v2471_v37 }
 0x1ed   : > { %v2311_v39 = vpop.trf.xlu0 }
 0x1ee   : > { %3067 = vmatprep.mubr.msk.f32.mxu0 %vm1998_vm0, %v2311_v39 }
 0x1ef   : > { %v2472_v27 = vpop.trf.xlu1 }
 0x1f0   : > { %3087 = vmatprep.mubr.msk.f32.mxu1 %vm1998_vm0, %v2472_v27 }
 0x1f1   : > { %v2312_v33 = vpop.trf.xlu0 }
 0x1f2   : > { %3068 = vmatmul.mubr.msk.f32.gmra.mrb[14].mxu0 %vm1998_vm0, %v2312_v33 }
 0x1f3   : > { %v2473_v40 = vpop.trf.xlu1 }
 0x1f4   : > { %3088 = vmatmul.mubr.msk.f32.gmra.mrb[14].mxu1 %vm1998_vm0, %v2473_v40 }
 0x297   : > { %v3020_v12 = vpop.f32.mrb[0].mxu0  ;;  %v3040_v28 = vpop.f32.mrb[0].mxu1 }
 0x298   : > { %v2089_v30 = vpop.f32.mrb[1].mxu0  ;;  %v2250_v35 = vpop.f32.mrb[1].mxu1 }
 0x299   : > { %2643 = vxpose.xlu1.b32.start [1/8] (short) (narrow) %v2250_v35, 8  ;;  %2611 = vxpose.xlu0.b32.start [1/8] (short) (narrow) %v2089_v30, 8 }
 0x29b   : > { %v3023_v41 = vpop.f32.mrb[2].mxu0  ;;  %v3043_v42 = vpop.f32.mrb[2].mxu1 }
 0x29c   : > { %v2099_v43 = vpop.f32.mrb[3].mxu0  ;;  %v2260_v44 = vpop.f32.mrb[3].mxu1 }
 0x29d   : > { %2644 = vxpose.xlu1.b32.cont [2/8] (short) (narrow) %v3040_v28, 8  ;;  %2612 = vxpose.xlu0.b32.cont [2/8] (short) (narrow) %v3020_v12, 8 }
 0x29f   : > { %v3026_v45 = vpop.f32.mrb[4].mxu0  ;;  %v3046_v17 = vpop.f32.mrb[4].mxu1 }
 0x2a0   : > { %v2109_v18 = vpop.f32.mrb[5].mxu0  ;;  %v2270_v46 = vpop.f32.mrb[5].mxu1 }
 0x2a1   : > { %2645 = vxpose.xlu1.b32.cont [3/8] (short) (narrow) %v2260_v44, 8  ;;  %2613 = vxpose.xlu0.b32.cont [3/8] (short) (narrow) %v2099_v43, 8 }
 0x2a5   : > { %2646 = vxpose.xlu1.b32.cont [4/8] (short) (narrow) %v3043_v42, 8  ;;  %2614 = vxpose.xlu0.b32.cont [4/8] (short) (narrow) %v3023_v41, 8  ;;  %v3029_v47 = vpop.f32.mrb[6].mxu0 }
 0x2a6   : > { %v2119_v48 = vpop.f32.mrb[7].mxu0 }
 0x2a7   : > { %v3049_v49 = vpop.f32.mrb[6].mxu1 }
 0x2a8   : > { %v2280_v50 = vpop.f32.mrb[7].mxu1 }
 0x2a9   : > { %2647 = vxpose.xlu1.b32.cont [5/8] (short) (narrow) %v2270_v46, 8  ;;  %2615 = vxpose.xlu0.b32.cont [5/8] (short) (narrow) %v2109_v18, 8 }
 0x2ad   : > { %2648 = vxpose.xlu1.b32.cont [6/8] (short) (narrow) %v3046_v17, 8  ;;  %2616 = vxpose.xlu0.b32.cont [6/8] (short) (narrow) %v3026_v45, 8  ;;  %v3060_v51 = vpop.f32.mrb[8].mxu0 }
 0x2ae   : > { %v2411_v52 = vpop.f32.mrb[9].mxu0 }
 0x2af   : > { %v3080_v53 = vpop.f32.mrb[8].mxu1 }
 0x2b0   : > { %v2572_v54 = vpop.f32.mrb[9].mxu1 }
 0x2b1   : > { %2649 = vxpose.xlu1.b32.cont [7/8] (short) (narrow) %v2280_v50, 8  ;;  %2617 = vxpose.xlu0.b32.cont [7/8] (short) (narrow) %v2119_v48, 8 }
 0x2b5   : > { %2650 = vxpose.xlu1.b32.end [8/8] (short) (narrow) %v3049_v49, 8  ;;  %2618 = vxpose.xlu0.b32.end [8/8] (short) (narrow) %v3029_v47, 8  ;;  %v3063_v55 = vpop.f32.mrb[10].mxu0 }
 0x2b6   : > { %v2421_v56 = vpop.f32.mrb[11].mxu0 }
 0x2b7   : > { %v3083_v57 = vpop.f32.mrb[10].mxu1 }
 0x2b8   : > { %v2582_v58 = vpop.f32.mrb[11].mxu1 }
 0x2b9   : > { %2707 = vxpose.xlu1.b32.start [1/8] (short) (narrow) %v2572_v54, 8  ;;  %2675 = vxpose.xlu0.b32.start [1/8] (short) (narrow) %v2411_v52, 8 }
 0x2bd   : > { %2708 = vxpose.xlu1.b32.cont [2/8] (short) (narrow) %v3080_v53, 8  ;;  %2676 = vxpose.xlu0.b32.cont [2/8] (short) (narrow) %v3060_v51, 8  ;;  %v3066_v59 = vpop.f32.mrb[12].mxu0 }
 0x2be   : > { %v2431_v60 = vpop.f32.mrb[13].mxu0 }
 0x2bf   : > { %v3086_v61 = vpop.f32.mrb[12].mxu1 }
 0x2c0   : > { %v2592_v62 = vpop.f32.mrb[13].mxu1 }
 0x2c1   : > { %2709 = vxpose.xlu1.b32.cont [3/8] (short) (narrow) %v2582_v58, 8  ;;  %2677 = vxpose.xlu0.b32.cont [3/8] (short) (narrow) %v2421_v56, 8 }
 0x2c5   : > { %2710 = vxpose.xlu1.b32.cont [4/8] (short) (narrow) %v3083_v57, 8  ;;  %2678 = vxpose.xlu0.b32.cont [4/8] (short) (narrow) %v3063_v55, 8  ;;  %v3069_v63 = vpop.f32.mrb[14].mxu0 }
 0x2c6   : > { %v2441_v0 = vpop.f32.mrb[15].mxu0 }
 0x2c7   : > { %v3089_v1 = vpop.f32.mrb[14].mxu1 }
 0x2c8   : > { %v2602_v2 = vpop.f32.mrb[15].mxu1 }
 0x2c9   : > { %2711 = vxpose.xlu1.b32.cont [5/8] (short) (narrow) %v2592_v62, 8  ;;  %2679 = vxpose.xlu0.b32.cont [5/8] (short) (narrow) %v2431_v60, 8 }
 0x2cd   : > { %2712 = vxpose.xlu1.b32.cont [6/8] (short) (narrow) %v3086_v61, 8  ;;  %2680 = vxpose.xlu0.b32.cont [6/8] (short) (narrow) %v3066_v59, 8 }
 0x2d1   : > { %2713 = vxpose.xlu1.b32.cont [7/8] (short) (narrow) %v2602_v2, 8  ;;  %2681 = vxpose.xlu0.b32.cont [7/8] (short) (narrow) %v2441_v0, 8 }
 0x2d5   : > { %2714 = vxpose.xlu1.b32.end [8/8] (short) (narrow) %v3089_v1, 8  ;;  %2682 = vxpose.xlu0.b32.end [8/8] (short) (narrow) %v3069_v63, 8 }
 0x319   : > { %v2659_v3 = vpop.trf.xlu1  ;;  %v2627_v4 = vpop.trf.xlu0 }
 0x339   : > { %v2723_v5 = vpop.trf.xlu1  ;;  %v2691_v6 = vpop.trf.xlu0 }
 0x33a   : > { %v2747_v7 = vcombine.low %v2659_v3, %v2723_v5  ;;  %v2739_v8 = vcombine.low %v2627_v4, %v2691_v6 }
 0x33c   : > { %v2754_v9 = vrot.slane %v2747_v7, %v3556_v19  ;;  %v2746_v10 = vrot.slane %v2739_v8, %v3556_v19 }
 0x33e   : > { %v2755_v13 = vcombine.low %v2746_v10, %v2754_v9  ;;  %v2756_v14 = vcombine.high %v2746_v10, %v2754_v9 }
 0x340   : > { %v2763_v16 = vrot.slane %v2755_v13, %v3560_v29  ;;  %v2770_v20 = vrot.slane %v2756_v14, %v3560_v29 }
 0x342   : > { %v2771_v21 = vcombine.high %v2763_v16, %v3358_v38  ;;  %v2772_v19 = vcombine.high %v2770_v20, %v3358_v38  ;;  %v2774_v22 = vadd.f32 %v2773_v15, %v2763_v16  ;;  %v2776_v23 = vadd.f32 %v2773_v15, %v2770_v20 }
 0x344   : > { %v2775_v29 = vadd.f32 %v2773_v15, %v2771_v21  ;;  %v2777_v24 = vadd.f32 %v2773_v15, %v2772_v19  ;;  %2779 = vst.msk [vmem:[%s242_s9] sm:$0xf] %vm2778_vm1, %v2774_v22  ;;  %2781 = vst.msk [vmem:[%s242_s9 + $0x8] sm:$0xf] %vm2778_vm1, %v2776_v23 }
 0x346   : > { %2780 = vst.msk [vmem:[%s242_s9 + $0x4] sm:$0xf] %vm2778_vm1, %v2775_v29  ;;  %2782 = vst.msk [vmem:[%s242_s9 + $0xc] sm:$0xf] %vm2778_vm1, %v2777_v24 }
 0x347   : > { %3275 = shalt.err (!%p3272_p5)
}
 0x348   : > { %s3276_s25 = scalar_lea.hbm %s3719_s26, 256  ;;  %s3280_s6 = scalar_lea.hbm %s3773_s3, 512 }
 0x349   : > { %p3277_p9 = scmp.ne.s32.totalorder %s3719_s26, %s3276_s25  ;;  %p3281_p3 = scmp.lt.u32.totalorder %s3719_s26, %s3773_s3 }
 0x34a   : > { %p3282_p7 = scmp.lt.u32.totalorder %s3280_s6, %s3276_s25  ;;  %p3284_p4 = scmp.lt.u32.totalorder %s3276_s25, %s3719_s26 }
 0x34b   : > { %p3278_p1 = pnand %p3277_p9, %p3478_p10 }
 0x34c   : > { %p3283_p13 = por %p3282_p7, %p3281_p3 }
 0x34d   : > { %p3279_p2 = pneg %p3278_p1 }
 0x34e   : > { %p3285_p6 = por %p3284_p4, %p3283_p13 }
 0x350   : > { %p3286_p8 = pnand %p3285_p6, %p3279_p2 }
 0x352   : > { %3289 = shalt.err (!%p3286_p8)
}
 0x353   : > { %s3360_s24 = smov 64   ;;  %s3361_s9 = smov 4  }
 0x354   : > { %3128 = dma.vmem_to_hbm [thread:$0]  (%p3478_p10), %s3721_s10, 256, %s3719_s26, %s2784_s15, %s3360_s24, %s3360_s24, %s3361_s9  }
 0x355 PF: > { %s2813_s11 = sand.u32 1, %s3328_s12   ;;  %p3791_p12 = scmp.ne.s32.totalorder %s3781_s23, 0 }
 0x356   : > { %p3792_p11 = scmp.ge.s32.totalorder %s3348_s17, 2  ;;  %s2814_s18 = scalar_lea.sflag [#allocation4], %s2813_s11 }
 0x358   : > { %p3139_p0 = pnand %p3792_p11, %p3791_p12 }
 0x35a   : > { %3323 = dma.done.wait (!%p3139_p0), %s2814_s18, 256  }
 0x35b   : > { %3325 = vsyncadd (!%p3139_p0), %s2814_s18, 4294967040  ;;  %s20_s17 = sadd.s32 1, %s3348_s17   ;;  %s3793_s12 = smov %s3332_s13 }
 0x35c   : > { %p17_p5 = scmp.ge.s32.totalorder %s20_s17, 4   ;;  %s3794_s13 = smov %s3336_s14 }
 0x35d   : > { %s3795_s14 = smov %s3487_s5  ;;  %s3796_s15 = smov %s3344_s16 }
 0x35e   : > { %s3797_s16 = smov %s3799_s28  ;;  %19 = sbr.rel (!%p17_p5) target bundleno = 7 (0x7), region = 85 }
 0x365   :  { %2819 = vsyncpa [#allocation3], 1 }
 0x366   :  { %2821 = vsyncpa [#allocation3 + $0x1], 1 }
 0x367   :  { %2822 = vsyncpa [#allocation6], 1 }
 0x368   :  { %2823 = vsyncpa [#allocation4], 1 }
 0x369   :  { %2825 = vsyncpa [#allocation4 + $0x1], 1 }

</bundles_post_ra>
